<compile_context>
chip_gen: v5e
topology: v5e:2x2
jax: 0.10.0
libtpu: 0.0.40
codegen_flags: <defaults>
</compile_context>

<pallas_src>
import functools

import jax
import jax.numpy as jnp
from jax.experimental import pallas as pl
from jax.experimental.pallas import tpu as pltpu


def _dwconv_kernel(x_ref, mask_ref, wd_ref, bd_ref, wp_ref, bp_ref, o_ref,
                   acc_ref, *, taps, center_tap):
    """One (batch, channel-tile) step of the fused DWConv.

    x_ref:    (1, TC, HWp)     input channel tile, flat spatial last
    mask_ref: (KK, HWp)        0/1 boundary-validity mask per tap (f32)
    wd_ref:   (TC, KK)         depthwise weights (BN scale folded in)
    bd_ref:   (TC, 1)          depthwise folded BN bias
    wp_ref:   (C_out, TC)      pointwise weight slice (BN scale folded in)
    bp_ref:   (C_out, 1)       pointwise folded BN bias
    o_ref:    (1, C_out, HWp)  output block (same block across the c axis)
    acc_ref:  (C_out, HWp)     f32 pointwise accumulator (VMEM scratch)
    taps:       static tuple of (tap_index, roll_shift) for off-center taps
    center_tap: static index of the zero-shift tap
    """
    c_step = pl.program_id(1)
    last_c = pl.num_programs(1) - 1

    x = x_ref[0].astype(jnp.float32)                     # (TC, HWp)
    wd = wd_ref[...].astype(jnp.float32)                 # (TC, KK)
    masks = mask_ref[...]                                # (KK, HWp)

    # --- depthwise conv: k*k shift-and-MAC; shifts on the XLU via roll -----
    # Center tap: shift==0 and its mask is all-ones -> no roll, no mask mul.
    acc = x * wd[:, center_tap:center_tap + 1]
    for t, s in taps:                                    # static, unrolled
        xs = pltpu.roll(x, shift=s, axis=1)              # wrap killed by mask
        acc = acc + xs * masks[t:t + 1, :] * wd[:, t:t + 1]

    # Depthwise folded-BN bias + SiLU (exp + approx reciprocal -> EUP slot).
    y = acc + bd_ref[...]
    y = y * pl.reciprocal(1.0 + jnp.exp(-y), approx=True)

    # --- pointwise 1x1 conv: bf16 MXU matmul, f32 accumulation over C tiles -
    @pl.when(c_step == 0)
    def _():
        acc_ref[...] = jnp.zeros_like(acc_ref)

    acc_ref[...] += jnp.dot(wp_ref[...].astype(jnp.bfloat16),
                            y.astype(jnp.bfloat16),
                            preferred_element_type=jnp.float32)

    @pl.when(c_step == last_c)
    def _():
        z = acc_ref[...] + bp_ref[...]
        z = z * pl.reciprocal(1.0 + jnp.exp(-z), approx=True)
        o_ref[0] = z.astype(o_ref.dtype)


@functools.partial(jax.jit, static_argnames=("ksize", "stride"))
def dwconv_forward(x, wd_scaled, bd, wp_scaled, bp, *, ksize, stride=1):
    """x: (B, C, H, W) NCHW. Returns (B, C_out, H, W) NCHW."""
    if stride != 1:
        # TODO(synk): depthwise stride > 1 (spatial subsampling) not implemented.
        raise NotImplementedError("dwconv_forward supports stride=1 only")
    assert ksize % 2 == 1, "ksize must be odd (same-padding depthwise conv)"

    B, C, H, W = x.shape
    C_out = wp_scaled.shape[0]
    KK = ksize * ksize
    p = (ksize - 1) // 2

    HW = H * W
    HWp = ((HW + 127) // 128) * 128            # lane-dense loads/stores
    x_flat = x.reshape(B, C, HW)               # free reshape (NCHW contiguous)
    if HWp != HW:
        x_flat = jnp.pad(x_flat, ((0, 0), (0, 0), (0, HWp - HW)))

    # Channel tile: whole C for small layers, 128-chunks for big ones (keeps
    # per-step VMEM bounded; the wp block's last dim must be 128-aligned or
    # equal to the full C).
    TC = 128 if (C > 128 and C % 128 == 0) else C
    n_c = C // TC

    # Static flat roll shifts + 0/1 boundary masks for each of the k*k taps.
    h_idx = jnp.arange(H, dtype=jnp.int32).reshape(H, 1)
    w_idx = jnp.arange(W, dtype=jnp.int32).reshape(1, W)
    taps = []
    center_tap = 0
    mask_rows = []
    for di in range(ksize):
        for dj in range(ksize):
            t = di * ksize + dj
            oy, ox = di - p, dj - p
            d = oy * W + ox                    # flat source offset of this tap
            if d == 0:
                center_tap = t
            else:
                taps.append((t, (-d) % HWp))   # roll so result[p] = x[p + d]
            valid = ((h_idx + oy >= 0) & (h_idx + oy < H) &
                     (w_idx + ox >= 0) & (w_idx + ox < W))
            row = valid.reshape(HW)
            if HWp != HW:
                row = jnp.pad(row, (0, HWp - HW))
            mask_rows.append(row)
    masks = jnp.stack(mask_rows, axis=0).astype(jnp.float32)   # (KK, HWp)
    taps = tuple(taps)

    kernel = functools.partial(_dwconv_kernel, taps=taps, center_tap=center_tap)

    itemsize = x.dtype.itemsize
    flops = 2 * B * HW * (C * KK + C_out * C)
    transcendentals = B * HW * (C + C_out)
    bytes_accessed = (B * C * HWp * itemsize + B * C_out * HWp * itemsize
                      + masks.size * 4 + wd_scaled.size * 4 + bd.size * 4
                      + wp_scaled.size * 4 + bp.size * 4)

    out_flat = pl.pallas_call(
        kernel,
        out_shape=jax.ShapeDtypeStruct((B, C_out, HWp), x.dtype),
        grid_spec=pltpu.PrefetchScalarGridSpec(
            num_scalar_prefetch=0,
            grid=(B, n_c),
            in_specs=[
                pl.BlockSpec((1, TC, HWp), lambda b, c: (b, c, 0)),
                pl.BlockSpec((KK, HWp), lambda b, c: (0, 0)),
                pl.BlockSpec((TC, KK), lambda b, c: (c, 0)),
                pl.BlockSpec((TC, 1), lambda b, c: (c, 0)),
                pl.BlockSpec((C_out, TC), lambda b, c: (0, c)),
                pl.BlockSpec((C_out, 1), lambda b, c: (0, 0)),
            ],
            out_specs=pl.BlockSpec((1, C_out, HWp), lambda b, c: (b, 0, 0)),
            scratch_shapes=[pltpu.VMEM((C_out, HWp), jnp.float32)],
        ),
        compiler_params=pltpu.CompilerParams(
            dimension_semantics=("parallel", "arbitrary")),
        cost_estimate=pl.CostEstimate(
            flops=flops, transcendentals=transcendentals,
            bytes_accessed=bytes_accessed),
    )(x_flat, masks, wd_scaled, bd, wp_scaled, bp)

    if HWp != HW:
        out_flat = out_flat[:, :, :HW]
    return out_flat.reshape(B, C_out, H, W)   # free reshape back to NCHW


def make_dwconv_params(key, in_channels, out_channels, ksize):
    """Deterministic synthetic parameters for DWConv(in, out, ksize)."""
    ks = jax.random.split(key, 10)
    return dict(
        # dconv: Conv2d(C, C, k, groups=C, bias=False) weight (C, 1, k, k)
        wd=jax.random.normal(ks[0], (in_channels, 1, ksize, ksize), jnp.float32) * 0.1,
        # pconv: Conv2d(C, C_out, 1, bias=False) weight (C_out, C, 1, 1)
        wp=jax.random.normal(ks[1], (out_channels, in_channels, 1, 1), jnp.float32) * 0.1,
        gamma_d=1.0 + 0.1 * jax.random.normal(ks[2], (in_channels,), jnp.float32),
        beta_d=0.1 * jax.random.normal(ks[3], (in_channels,), jnp.float32),
        mean_d=0.05 * jax.random.normal(ks[4], (in_channels,), jnp.float32),
        var_d=1.0 + 0.1 * jax.random.uniform(ks[5], (in_channels,), jnp.float32),
        gamma_p=1.0 + 0.1 * jax.random.normal(ks[6], (out_channels,), jnp.float32),
        beta_p=0.1 * jax.random.normal(ks[7], (out_channels,), jnp.float32),
        mean_p=0.05 * jax.random.normal(ks[8], (out_channels,), jnp.float32),
        var_p=1.0 + 0.1 * jax.random.uniform(ks[9], (out_channels,), jnp.float32),
    )


def fold_dwconv_params(params, eps=1e-5):
    """Fold eval-mode BatchNorm into the conv weights."""
    wd, wp = params["wd"], params["wp"]
    C, _, k, _ = wd.shape
    C_out = wp.shape[0]
    scale_d = params["gamma_d"] / jnp.sqrt(params["var_d"] + eps)
    scale_p = params["gamma_p"] / jnp.sqrt(params["var_p"] + eps)
    wd_scaled = wd.reshape(C, k * k) * scale_d[:, None]                 # (C, k*k)
    bd = (params["beta_d"] - params["mean_d"] * scale_d).reshape(C, 1)
    wp_scaled = wp.reshape(C_out, C) * scale_p[:, None]                 # (C_out, C)
    bp = (params["beta_p"] - params["mean_p"] * scale_p).reshape(C_out, 1)
    return wd_scaled, bd, wp_scaled, bp


def _reference_forward(x, params, eps=1e-5):
    """Pure-JAX (lax.conv) reference of DWConv with eval-mode BatchNorm."""
    wd, wp = params["wd"], params["wp"]
    C = wd.shape[0]
    k = wd.shape[2]
    p = (k - 1) // 2

    def bn_silu(v, gamma, beta, mean, var):
        inv = gamma / jnp.sqrt(var + eps)
        v = (v - mean.reshape(1, -1, 1, 1)) * inv.reshape(1, -1, 1, 1) \
            + beta.reshape(1, -1, 1, 1)
        return v * jax.nn.sigmoid(v)

    y = jax.lax.conv_general_dilated(
        x.astype(jnp.float32), wd, window_strides=(1, 1),
        padding=[(p, p), (p, p)],
        dimension_numbers=("NCHW", "OIHW", "NCHW"),
        feature_group_count=C, precision=jax.lax.Precision.HIGHEST)
    y = bn_silu(y, params["gamma_d"], params["beta_d"],
                params["mean_d"], params["var_d"])
    z = jax.lax.conv_general_dilated(
        y, wp, window_strides=(1, 1), padding=[(0, 0), (0, 0)],
        dimension_numbers=("NCHW", "OIHW", "NCHW"),
        precision=jax.lax.Precision.HIGHEST)
    z = bn_silu(z, params["gamma_p"], params["beta_p"],
                params["mean_p"], params["var_p"])
    return z


if __name__ == "__main__":
    key = jax.random.PRNGKey(0)
    k_x, k_p = jax.random.split(key)

    B, C, H, W = 2, 4, 16, 16
    C_out, ksize = 8, 3

    x = jax.random.normal(k_x, (B, C, H, W), jnp.float32)
    params = make_dwconv_params(k_p, C, C_out, ksize)
    wd_s, bd, wp_s, bp = fold_dwconv_params(params)

    ref = _reference_forward(x, params)

    # f32 I/O path.  Tolerance reflects the intentional fast path in-kernel:
    # bf16 MXU for the pointwise matmul + approx-EUP reciprocal in SiLU.
    out = dwconv_forward(x, wd_s, bd, wp_s, bp, ksize=ksize)
    out = jax.block_until_ready(out)
    assert out.shape == (B, C_out, H, W), out.shape
    err = float(jnp.max(jnp.abs(out - ref)))
    assert jnp.allclose(out, ref, atol=5e-3, rtol=5e-3), err

    # bf16 I/O path (halves HBM traffic on this mem-bound op); accumulation,
    # BN bias and activations stay f32 in-kernel.
    out_bf16 = dwconv_forward(x.astype(jnp.bfloat16), wd_s, bd, wp_s, bp,
                              ksize=ksize)
    out_bf16 = jax.block_until_ready(out_bf16)
    err_bf16 = float(jnp.max(jnp.abs(out_bf16.astype(jnp.float32) - ref)))
    assert jnp.allclose(out_bf16.astype(jnp.float32), ref,
                        atol=2e-2, rtol=2e-2), err_bf16

    print("KERNEL_OK")
</pallas_src>

<mosaic_0001>
module attributes {stable_mosaic.version = 11 : i64} {
  func.func @_dwconv_kernel(%arg0: i32, %arg1: i32, %arg2: memref<1x4x256xf32, #tpu.memory_space<vmem>>, %arg3: memref<9x256xf32, #tpu.memory_space<vmem>>, %arg4: memref<4x9xf32, #tpu.memory_space<vmem>>, %arg5: memref<4x1xf32, #tpu.memory_space<vmem>>, %arg6: memref<8x4xf32, #tpu.memory_space<vmem>>, %arg7: memref<8x1xf32, #tpu.memory_space<vmem>>, %arg8: memref<1x8x256xf32, #tpu.memory_space<vmem>>, %arg9: memref<8x256xf32, #tpu.memory_space<vmem>>) attributes {dimension_semantics = [#tpu.dimension_semantics<parallel>, #tpu.dimension_semantics<arbitrary>], iteration_bounds = array<i64: 2, 1>, scalar_prefetch = 0 : i64, scratch_operands = 1 : i64, tpu.core_type = #tpu.core_type<tc>, window_params = [{transform_indices = @transform_0, window_bounds = array<i64: 1, 4, 256>}, {pipeline_mode = #tpu.pipeline_mode<synchronous>, transform_indices = @transform_1, window_bounds = array<i64: 9, 256>}, {transform_indices = @transform_2, window_bounds = array<i64: 4, 9>}, {transform_indices = @transform_3, window_bounds = array<i64: 4, 1>}, {transform_indices = @transform_4, window_bounds = array<i64: 8, 4>}, {pipeline_mode = #tpu.pipeline_mode<synchronous>, transform_indices = @transform_5, window_bounds = array<i64: 8, 1>}, {transform_indices = @transform_6, window_bounds = array<i64: 1, 8, 256>}]} {
    %c0 = arith.constant 0 : index
    %c0_0 = arith.constant 0 : index
    %c0_1 = arith.constant 0 : index
    %0 = vector.load %arg2[%c0, %c0_0, %c0_1] : memref<1x4x256xf32, #tpu.memory_space<vmem>>, vector<1x4x256xf32>
    %1 = vector.shape_cast %0 : vector<1x4x256xf32> to vector<4x256xf32>
    %c0_2 = arith.constant 0 : index
    %c0_3 = arith.constant 0 : index
    %2 = vector.load %arg4[%c0_2, %c0_3] : memref<4x9xf32, #tpu.memory_space<vmem>>, vector<4x9xf32>
    %c0_4 = arith.constant 0 : index
    %c0_5 = arith.constant 0 : index
    %3 = vector.load %arg3[%c0_4, %c0_5] : memref<9x256xf32, #tpu.memory_space<vmem>>, vector<9x256xf32>
    %4 = vector.extract_strided_slice %2 {offsets = [0, 4], sizes = [4, 1], strides = [1, 1]} : vector<4x9xf32> to vector<4x1xf32>
    %5 = vector.broadcast %4 : vector<4x1xf32> to vector<4x256xf32>
    %6 = arith.mulf %1, %5 : vector<4x256xf32>
    %c17_i32 = arith.constant 17 : i32
    %7 = tpu.dynamic_rotate %1 by %c17_i32 dim 1 : vector<4x256xf32>, i32 -> vector<4x256xf32>
    %8 = vector.extract_strided_slice %3 {offsets = [0, 0], sizes = [1, 256], strides = [1, 1]} : vector<9x256xf32> to vector<1x256xf32>
    %9 = vector.broadcast %8 : vector<1x256xf32> to vector<4x256xf32>
    %10 = arith.mulf %7, %9 : vector<4x256xf32>
    %11 = vector.extract_strided_slice %2 {offsets = [0, 0], sizes = [4, 1], strides = [1, 1]} : vector<4x9xf32> to vector<4x1xf32>
    %12 = vector.broadcast %11 : vector<4x1xf32> to vector<4x256xf32>
    %13 = arith.mulf %10, %12 : vector<4x256xf32>
    %14 = arith.addf %6, %13 : vector<4x256xf32>
    %c16_i32 = arith.constant 16 : i32
    %15 = tpu.dynamic_rotate %1 by %c16_i32 dim 1 : vector<4x256xf32>, i32 -> vector<4x256xf32>
    %16 = vector.extract_strided_slice %3 {offsets = [1, 0], sizes = [1, 256], strides = [1, 1]} : vector<9x256xf32> to vector<1x256xf32>
    %17 = vector.broadcast %16 : vector<1x256xf32> to vector<4x256xf32>
    %18 = arith.mulf %15, %17 : vector<4x256xf32>
    %19 = vector.extract_strided_slice %2 {offsets = [0, 1], sizes = [4, 1], strides = [1, 1]} : vector<4x9xf32> to vector<4x1xf32>
    %20 = vector.broadcast %19 : vector<4x1xf32> to vector<4x256xf32>
    %21 = arith.mulf %18, %20 : vector<4x256xf32>
    %22 = arith.addf %14, %21 : vector<4x256xf32>
    %c15_i32 = arith.constant 15 : i32
    %23 = tpu.dynamic_rotate %1 by %c15_i32 dim 1 : vector<4x256xf32>, i32 -> vector<4x256xf32>
    %24 = vector.extract_strided_slice %3 {offsets = [2, 0], sizes = [1, 256], strides = [1, 1]} : vector<9x256xf32> to vector<1x256xf32>
    %25 = vector.broadcast %24 : vector<1x256xf32> to vector<4x256xf32>
    %26 = arith.mulf %23, %25 : vector<4x256xf32>
    %27 = vector.extract_strided_slice %2 {offsets = [0, 2], sizes = [4, 1], strides = [1, 1]} : vector<4x9xf32> to vector<4x1xf32>
    %28 = vector.broadcast %27 : vector<4x1xf32> to vector<4x256xf32>
    %29 = arith.mulf %26, %28 : vector<4x256xf32>
    %30 = arith.addf %22, %29 : vector<4x256xf32>
    %c1_i32 = arith.constant 1 : i32
    %31 = tpu.dynamic_rotate %1 by %c1_i32 dim 1 : vector<4x256xf32>, i32 -> vector<4x256xf32>
    %32 = vector.extract_strided_slice %3 {offsets = [3, 0], sizes = [1, 256], strides = [1, 1]} : vector<9x256xf32> to vector<1x256xf32>
    %33 = vector.broadcast %32 : vector<1x256xf32> to vector<4x256xf32>
    %34 = arith.mulf %31, %33 : vector<4x256xf32>
    %35 = vector.extract_strided_slice %2 {offsets = [0, 3], sizes = [4, 1], strides = [1, 1]} : vector<4x9xf32> to vector<4x1xf32>
    %36 = vector.broadcast %35 : vector<4x1xf32> to vector<4x256xf32>
    %37 = arith.mulf %34, %36 : vector<4x256xf32>
    %38 = arith.addf %30, %37 : vector<4x256xf32>
    %c255_i32 = arith.constant 255 : i32
    %39 = tpu.dynamic_rotate %1 by %c255_i32 dim 1 : vector<4x256xf32>, i32 -> vector<4x256xf32>
    %40 = vector.extract_strided_slice %3 {offsets = [5, 0], sizes = [1, 256], strides = [1, 1]} : vector<9x256xf32> to vector<1x256xf32>
    %41 = vector.broadcast %40 : vector<1x256xf32> to vector<4x256xf32>
    %42 = arith.mulf %39, %41 : vector<4x256xf32>
    %43 = vector.extract_strided_slice %2 {offsets = [0, 5], sizes = [4, 1], strides = [1, 1]} : vector<4x9xf32> to vector<4x1xf32>
    %44 = vector.broadcast %43 : vector<4x1xf32> to vector<4x256xf32>
    %45 = arith.mulf %42, %44 : vector<4x256xf32>
    %46 = arith.addf %38, %45 : vector<4x256xf32>
    %c241_i32 = arith.constant 241 : i32
    %47 = tpu.dynamic_rotate %1 by %c241_i32 dim 1 : vector<4x256xf32>, i32 -> vector<4x256xf32>
    %48 = vector.extract_strided_slice %3 {offsets = [6, 0], sizes = [1, 256], strides = [1, 1]} : vector<9x256xf32> to vector<1x256xf32>
    %49 = vector.broadcast %48 : vector<1x256xf32> to vector<4x256xf32>
    %50 = arith.mulf %47, %49 : vector<4x256xf32>
    %51 = vector.extract_strided_slice %2 {offsets = [0, 6], sizes = [4, 1], strides = [1, 1]} : vector<4x9xf32> to vector<4x1xf32>
    %52 = vector.broadcast %51 : vector<4x1xf32> to vector<4x256xf32>
    %53 = arith.mulf %50, %52 : vector<4x256xf32>
    %54 = arith.addf %46, %53 : vector<4x256xf32>
    %c240_i32 = arith.constant 240 : i32
    %55 = tpu.dynamic_rotate %1 by %c240_i32 dim 1 : vector<4x256xf32>, i32 -> vector<4x256xf32>
    %56 = vector.extract_strided_slice %3 {offsets = [7, 0], sizes = [1, 256], strides = [1, 1]} : vector<9x256xf32> to vector<1x256xf32>
    %57 = vector.broadcast %56 : vector<1x256xf32> to vector<4x256xf32>
    %58 = arith.mulf %55, %57 : vector<4x256xf32>
    %59 = vector.extract_strided_slice %2 {offsets = [0, 7], sizes = [4, 1], strides = [1, 1]} : vector<4x9xf32> to vector<4x1xf32>
    %60 = vector.broadcast %59 : vector<4x1xf32> to vector<4x256xf32>
    %61 = arith.mulf %58, %60 : vector<4x256xf32>
    %62 = arith.addf %54, %61 : vector<4x256xf32>
    %c239_i32 = arith.constant 239 : i32
    %63 = tpu.dynamic_rotate %1 by %c239_i32 dim 1 : vector<4x256xf32>, i32 -> vector<4x256xf32>
    %64 = vector.extract_strided_slice %3 {offsets = [8, 0], sizes = [1, 256], strides = [1, 1]} : vector<9x256xf32> to vector<1x256xf32>
    %65 = vector.broadcast %64 : vector<1x256xf32> to vector<4x256xf32>
    %66 = arith.mulf %63, %65 : vector<4x256xf32>
    %67 = vector.extract_strided_slice %2 {offsets = [0, 8], sizes = [4, 1], strides = [1, 1]} : vector<4x9xf32> to vector<4x1xf32>
    %68 = vector.broadcast %67 : vector<4x1xf32> to vector<4x256xf32>
    %69 = arith.mulf %66, %68 : vector<4x256xf32>
    %70 = arith.addf %62, %69 : vector<4x256xf32>
    %c0_6 = arith.constant 0 : index
    %c0_7 = arith.constant 0 : index
    %71 = vector.load %arg5[%c0_6, %c0_7] : memref<4x1xf32, #tpu.memory_space<vmem>>, vector<4x1xf32>
    %72 = vector.broadcast %71 : vector<4x1xf32> to vector<4x256xf32>
    %73 = arith.addf %70, %72 : vector<4x256xf32>
    %cst = arith.constant 0.000000e+00 : f32
    %74 = vector.broadcast %cst : f32 to vector<4x256xf32>
    %75 = arith.subf %74, %73 : vector<4x256xf32>
    %76 = math.exp %75 : vector<4x256xf32>
    %cst_8 = arith.constant 1.000000e+00 : f32
    %77 = vector.broadcast %cst_8 : f32 to vector<4x256xf32>
    %78 = arith.addf %77, %76 : vector<4x256xf32>
    %79 = tpu.reciprocal %78 {approx = true} : vector<4x256xf32> -> vector<4x256xf32>
    %80 = arith.mulf %73, %79 : vector<4x256xf32>
    %c0_i32 = arith.constant 0 : i32
    %81 = arith.cmpi eq, %arg1, %c0_i32 : i32
    %82 = arith.extui %81 : i1 to i32
    %c0_i32_9 = arith.constant 0 : i32
    %83 = arith.cmpi ne, %82, %c0_i32_9 : i32
    scf.if %83 {
      %cst_19 = arith.constant 0.000000e+00 : f32
      %94 = vector.broadcast %cst_19 : f32 to vector<8x256xf32>
      %c0_20 = arith.constant 0 : index
      %c0_21 = arith.constant 0 : index
      %95 = vector.load %arg9[%c0_20, %c0_21] : memref<8x256xf32, #tpu.memory_space<vmem>>, vector<8x256xf32>
      tpu.vector_store %arg9[%c0_20, %c0_21], %94 {strides = array<i32>} : memref<8x256xf32, #tpu.memory_space<vmem>>, vector<8x256xf32>,
    } else {
    }
    %c0_10 = arith.constant 0 : index
    %c0_11 = arith.constant 0 : index
    %84 = vector.load %arg9[%c0_10, %c0_11] : memref<8x256xf32, #tpu.memory_space<vmem>>, vector<8x256xf32>
    %c0_12 = arith.constant 0 : index
    %c0_13 = arith.constant 0 : index
    %85 = vector.load %arg6[%c0_12, %c0_13] : memref<8x4xf32, #tpu.memory_space<vmem>>, vector<8x4xf32>
    %86 = arith.truncf %85 : vector<8x4xf32> to vector<8x4xbf16>
    %87 = arith.truncf %80 : vector<4x256xf32> to vector<4x256xbf16>
    %cst_14 = arith.constant dense<0.000000e+00> : vector<8x256xf32>
    %88 = tpu.matmul %86, %87, %cst_14 {dimension_numbers = #tpu.dot_dimension_numbers<[1], [0], [0], [1], [0, 0, 1, 1], [], []>} : vector<8x4xbf16>, vector<4x256xbf16>, vector<8x256xf32> -> vector<8x256xf32>
    %89 = arith.addf %84, %88 : vector<8x256xf32>
    %c0_15 = arith.constant 0 : index
    %c0_16 = arith.constant 0 : index
    %90 = vector.load %arg9[%c0_15, %c0_16] : memref<8x256xf32, #tpu.memory_space<vmem>>, vector<8x256xf32>
    tpu.vector_store %arg9[%c0_15, %c0_16], %89 {strides = array<i32>} : memref<8x256xf32, #tpu.memory_space<vmem>>, vector<8x256xf32>,
    %c0_i32_17 = arith.constant 0 : i32
    %91 = arith.cmpi eq, %arg1, %c0_i32_17 : i32
    %92 = arith.extui %91 : i1 to i32
    %c0_i32_18 = arith.constant 0 : i32
    %93 = arith.cmpi ne, %92, %c0_i32_18 : i32
    scf.if %93 {
      %c0_19 = arith.constant 0 : index
      %c0_20 = arith.constant 0 : index
      %94 = vector.load %arg9[%c0_19, %c0_20] : memref<8x256xf32, #tpu.memory_space<vmem>>, vector<8x256xf32>
      %c0_21 = arith.constant 0 : index
      %c0_22 = arith.constant 0 : index
      %95 = vector.load %arg7[%c0_21, %c0_22] : memref<8x1xf32, #tpu.memory_space<vmem>>, vector<8x1xf32>
      %96 = vector.broadcast %95 : vector<8x1xf32> to vector<8x256xf32>
      %97 = arith.addf %94, %96 : vector<8x256xf32>
      %cst_23 = arith.constant 0.000000e+00 : f32
      %98 = vector.broadcast %cst_23 : f32 to vector<8x256xf32>
      %99 = arith.subf %98, %97 : vector<8x256xf32>
      %100 = math.exp %99 : vector<8x256xf32>
      %cst_24 = arith.constant 1.000000e+00 : f32
      %101 = vector.broadcast %cst_24 : f32 to vector<8x256xf32>
      %102 = arith.addf %101, %100 : vector<8x256xf32>
      %103 = tpu.reciprocal %102 {approx = true} : vector<8x256xf32> -> vector<8x256xf32>
      %104 = arith.mulf %97, %103 : vector<8x256xf32>
      %c0_25 = arith.constant 0 : index
      %c0_26 = arith.constant 0 : index
      %c0_27 = arith.constant 0 : index
      %105 = vector.load %arg8[%c0_25, %c0_26, %c0_27] : memref<1x8x256xf32, #tpu.memory_space<vmem>>, vector<1x8x256xf32>
      %106 = vector.shape_cast %105 : vector<1x8x256xf32> to vector<8x256xf32>
      %107 = vector.shape_cast %104 : vector<8x256xf32> to vector<1x8x256xf32>
      tpu.vector_store %arg8[%c0_25, %c0_26, %c0_27], %107 {strides = array<i32>} : memref<1x8x256xf32, #tpu.memory_space<vmem>>, vector<1x8x256xf32>,
    } else {
    }
    return
  }
  func.func @transform_0(%arg0: i32, %arg1: i32) -> (i32, i32, i32) {
    %c0_i32 = arith.constant 0 : i32
    %c0_i32_0 = arith.constant 0 : i32
    return %arg0, %arg1, %c0_i32 : i32, i32, i32
  }
  func.func @transform_1(%arg0: i32, %arg1: i32) -> (i32, i32) {
    %c0_i32 = arith.constant 0 : i32
    %c0_i32_0 = arith.constant 0 : i32
    %c0_i32_1 = arith.constant 0 : i32
    return %c0_i32, %c0_i32_0 : i32, i32
  }
  func.func @transform_2(%arg0: i32, %arg1: i32) -> (i32, i32) {
    %c0_i32 = arith.constant 0 : i32
    %c0_i32_0 = arith.constant 0 : i32
    return %arg1, %c0_i32 : i32, i32
  }
  func.func @transform_3(%arg0: i32, %arg1: i32) -> (i32, i32) {
    %c0_i32 = arith.constant 0 : i32
    %c0_i32_0 = arith.constant 0 : i32
    return %arg1, %c0_i32 : i32, i32
  }
  func.func @transform_4(%arg0: i32, %arg1: i32) -> (i32, i32) {
    %c0_i32 = arith.constant 0 : i32
    %c0_i32_0 = arith.constant 0 : i32
    return %c0_i32, %arg1 : i32, i32
  }
  func.func @transform_5(%arg0: i32, %arg1: i32) -> (i32, i32) {
    %c0_i32 = arith.constant 0 : i32
    %c0_i32_0 = arith.constant 0 : i32
    %c0_i32_1 = arith.constant 0 : i32
    return %c0_i32, %c0_i32_0 : i32, i32
  }
  func.func @transform_6(%arg0: i32, %arg1: i32) -> (i32, i32, i32) {
    %c0_i32 = arith.constant 0 : i32
    %c0_i32_0 = arith.constant 0 : i32
    %c0_i32_1 = arith.constant 0 : i32
    return %arg0, %c0_i32, %c0_i32_0 : i32, i32, i32
  }
}

</mosaic_0001>

<bundles_post_ra>
// kernel: dwconv_forward.1
= control target key start
LH: loop header
LB: loop body
LE: loop exit
PB: predicated region body
PF: predicated region fallthrough
CT: control target
= control target key end

     0   :  { %s958_s21 = smov 0   ;;  %s960_s22 = smov 0   ;;  %s1148_s0 = inlined_call_operand.vmem [shape: f32[2,4,256], index: 0, kind: input, shape index: {}]   ;;  %s1149_s1 = inlined_call_operand.vmem [shape: f32[9,256], index: 1, kind: input, shape index: {}]   ;;  %s1150_s2 = inlined_call_operand.vmem [shape: f32[4,9], index: 2, kind: input, shape index: {}]   ;;  %s1151_s3 = inlined_call_operand.vmem [shape: f32[4,1], index: 3, kind: input, shape index: {}]   ;;  %s1152_s4 = inlined_call_operand.vmem [shape: f32[8,4], index: 4, kind: input, shape index: {}]   ;;  %s1153_s5 = inlined_call_operand.vmem [shape: f32[8,1], index: 5, kind: input, shape index: {}]   ;;  %s1154_s6 = inlined_call_operand.vmem [shape: f32[2,8,256], index: 6, kind: output, shape index: {}]  }
   0x1   :  { %s962_s23 = smov 0  }
   0x2 LB: > { %s28_s24 = sadd.s32 1, %s899_s22  ;;  %p802_p0 = scmp.ge.s32.totalorder %s903_s23, 1  ;;  %s903_s23 = sphi %s962_s23, %s16_s23   ;;  %s899_s22 = sphi %s960_s22, %s1156_s22   ;;  %s895_s21 = sphi %s958_s21, %s1155_s21  }
   0x3   : > { %p30_p1 = scmp.ge.s32.totalorder %s28_s24, 2  ;;  %p257_p2 = scmp.lt.s32.totalorder %s903_s23, 3 }
   0x5   : > { %s1158_s24 = smov (%p30_p1, %s28_s24), 0  ;;  %p258_p3 = pnand %p802_p0, %p257_p2 }
   0x6   : > { %p303_p4 = scmp.lt.s32.totalorder (!%p258_p3), %s895_s21, 1  ;;  %s907_s7 = smov (!%p258_p3), 17  }
   0x7   : > { %261 = sbr.rel (%p258_p3) target bundleno = 404 (0x194), region = 44  ;;  %s909_s8 = smov (!%p258_p3), 16  }
   0x8   : > { %s911_s9 = smov (!%p258_p3), 15   ;;  %s913_s10 = smov (!%p258_p3), 1  }
   0x9   : > { %s915_s11 = smov (!%p258_p3), 127   ;;  %s917_s12 = smov (!%p258_p3), 113  }
   0xa   : > { %s919_s13 = smov (!%p258_p3), 112   ;;  %s921_s14 = smov (!%p258_p3), 111  }
   0xc   : > { %v979_v0 = vld [vmem:[%s1150_s2] sm:$0xf]  ;;  %v905_v1 = vmov 0   ;;  %s1160_s21 = smov (!%p303_p4, %s895_s21), 1  ;;  %v906_v3 = vmov 4   ;;  %v908_v6 = vmov 1   ;;  %v356_v40 = vlaneseq }
   0xd   : > { %855 = vset.pattern.permute.xlu2 %v905_v1  ;;  %864 = vset.pattern.permute.xlu1 %v905_v1  ;;  %s811_s27 = sshll.u32 %s1160_s21, 3  ;;  %v910_v9 = vmov 2   ;;  %v912_v12 = vmov 3   ;;  %v914_v17 = vmov 5   ;;  %v916_v18 = vmov 8   ;;  %v1028_v44 = vld [vmem:[%s1149_s1 + $0x8] sm:$0xff] }
   0xe   : > { %366 = vperm.xlu2 %855, %v979_v0   ;;  %s311_s30 = scalar_lea.vmem %s1148_s0, %s811_s27  ;;  %863 = vset.pattern.permute.xlu0 %v916_v18  ;;  %v918_v21 = vmov 6   ;;  %v920_v24 = vmov 7   ;;  %v574_v27 = vld [vmem:[%s1151_s3] sm:$0xf]  ;;  %v1023_v43 = vand.u32 127, %v356_v40  ;;  %v362_v46 = vperm.slane %v1028_v44, 0 }
   0xf   : > { %v990_v2 = vld [vmem:[%s311_s30] sm:$0xff]  ;;  %v391_v48 = vperm.slane %v1028_v44, 1  ;;  %v922_v51 = vmov 839922192   ;;  %v419_v56 = vperm.slane %v1028_v44, 2  ;;  %vm374_vm6 = vcmask 1043456  }
  0x10   : > { %347 = vst [vmem:[#allocation1] ss:$2 sm:$0xff] %v990_v2  ;;  %vm358_vm0 = vcmp.lt.s32.totalorder %v1023_v43, 17  ;;  %vm387_vm1 = vcmp.lt.s32.totalorder %v1023_v43, 16  ;;  %v1040_v52 = vunpack.c.l.s4 %v922_v51  ;;  %vm415_vm2 = vcmp.lt.s32.totalorder %v1023_v43, 15  ;;  %v1048_v54 = vld [vmem:[%s1149_s1] sm:$0xff] }
  0x11   : > { %vm443_vm3 = vcmp.lt.s32.totalorder %v1023_v43, 1  ;;  %v361_v59 = vperm.slane %v1048_v54, 0  ;;  %v390_v61 = vperm.slane %v1048_v54, 1  ;;  %vm471_vm4 = vcmp.lt.s32.totalorder %v1023_v43, 127 }
  0x12   : > { %v342_v60 = vunpack.c.0.s8 %v1040_v52  ;;  %vm499_vm5 = vcmp.lt.s32.totalorder %v1023_v43, 113  ;;  %vm527_vm7 = vcmp.lt.s32.totalorder %v1023_v43, 112  ;;  %vm555_vm8 = vcmp.lt.s32.totalorder %v1023_v43, 111  ;;  %v599_v52 = vld [vmem:[%s1152_s4] sm:$0xff] }
  0x13   : > { %vm613_vm9 = vcmask 1041408   ;;  %vm609_vm10 = vcmask 31744  }
  0x16   : > { %856 = vset.pattern.permute.xlu2 %v906_v3 }
  0x17   : > { %338 = vperm.xlu2 %856, %v979_v0   ;;  %v348_v4 = vld.sshfl [vmem:[#allocation1] sm:$0xff pattern:$0x75316420]  ;;  %v349_v5 = vld.sshfl [vmem:[#allocation1 + $0x8] sm:$0xff pattern:$0x75316420] }
  0x18   : > { %352 = vrot.lane.b32.xlu0 %v348_v4, %s907_s7  ;;  %378 = vst [vmem:[#allocation1] ss:$2 sm:$0xff] %v990_v2 }
  0x1f   : > { %857 = vset.pattern.permute.xlu2 %v908_v6  ;;  %v379_v7 = vld.sshfl [vmem:[#allocation1] sm:$0xff pattern:$0x75316420]  ;;  %v380_v8 = vld.sshfl [vmem:[#allocation1 + $0x8] sm:$0xff pattern:$0x75316420] }
  0x20   : > { %395 = vperm.xlu2 %857, %v979_v0   ;;  %354 = vrot.lane.b32.xlu0 %v349_v5, %s907_s7  ;;  %406 = vst [vmem:[#allocation1] ss:$2 sm:$0xff] %v990_v2 }
  0x21   : > { %383 = vrot.lane.b32.xlu1 %v379_v7, %s909_s8  ;;  %v475_v7 = vperm.slane %v1028_v44, 5 }
  0x27   : > { %v407_v10 = vld.sshfl [vmem:[#allocation1] sm:$0xff pattern:$0x75316420]  ;;  %v408_v11 = vld.sshfl [vmem:[#allocation1 + $0x8] sm:$0xff pattern:$0x75316420] }
  0x28   : > { %858 = vset.pattern.permute.xlu2 %v910_v9  ;;  %411 = vrot.lane.b32.xlu0 %v407_v10, %s911_s9  ;;  %434 = vst [vmem:[#allocation1] ss:$2 sm:$0xff] %v990_v2 }
  0x29   : > { %423 = vperm.xlu2 %858, %v979_v0   ;;  %385 = vrot.lane.b32.xlu1 %v380_v8, %s909_s8 }
  0x2f   : > { %v435_v13 = vld.sshfl [vmem:[#allocation1] sm:$0xff pattern:$0x75316420]  ;;  %v436_v14 = vld.sshfl [vmem:[#allocation1 + $0x8] sm:$0xff pattern:$0x75316420] }
  0x30   : > { %439 = vrot.lane.b32.xlu0 %v435_v13, %s913_s10  ;;  %462 = vst [vmem:[#allocation1] ss:$2 sm:$0xff] %v990_v2 }
  0x31   : > { %859 = vset.pattern.permute.xlu2 %v912_v12  ;;  %413 = vrot.lane.b32.xlu1 %v408_v11, %s911_s9  ;;  %v418_v12 = vperm.slane %v1048_v54, 2  ;;  %s812_s9 = sshll.u32 %s1160_s21, 4 }
  0x32   : > { %451 = vperm.xlu2 %859, %v979_v0  }
  0x37   : > { %v463_v15 = vld.sshfl [vmem:[#allocation1] sm:$0xff pattern:$0x75316420]  ;;  %v464_v16 = vld.sshfl [vmem:[#allocation1 + $0x8] sm:$0xff pattern:$0x75316420] }
  0x38   : > { %467 = vrot.lane.b32.xlu0 %v463_v15, %s915_s11  ;;  %490 = vst [vmem:[#allocation1] ss:$2 sm:$0xff] %v990_v2 }
  0x39   : > { %441 = vrot.lane.b32.xlu1 %v436_v14, %s913_s10 }
  0x3a   : > { %860 = vset.pattern.permute.xlu2 %v914_v17  ;;  %v503_v17 = vperm.slane %v1028_v44, 6 }
  0x3b   : > { %479 = vperm.xlu2 %860, %v979_v0  }
  0x3f   : > { %v491_v19 = vld.sshfl [vmem:[#allocation1] sm:$0xff pattern:$0x75316420]  ;;  %v492_v20 = vld.sshfl [vmem:[#allocation1 + $0x8] sm:$0xff pattern:$0x75316420] }
  0x40   : > { %495 = vrot.lane.b32.xlu0 %v491_v19, %s917_s12  ;;  %518 = vst [vmem:[#allocation1] ss:$2 sm:$0xff] %v990_v2 }
  0x41   : > { %469 = vrot.lane.b32.xlu1 %v464_v16, %s915_s11 }
  0x43   : > { %861 = vset.pattern.permute.xlu2 %v918_v21 }
  0x44   : > { %507 = vperm.xlu2 %861, %v979_v0  }
  0x47   : > { %v519_v22 = vld.sshfl [vmem:[#allocation1] sm:$0xff pattern:$0x75316420]  ;;  %v520_v23 = vld.sshfl [vmem:[#allocation1 + $0x8] sm:$0xff pattern:$0x75316420] }
  0x48   : > { %523 = vrot.lane.b32.xlu0 %v519_v22, %s919_s13  ;;  %546 = vst [vmem:[#allocation1] ss:$2 sm:$0xff] %v990_v2  ;;  %v446_v22 = vperm.slane %v1048_v54, 3 }
  0x49   : > { %497 = vrot.lane.b32.xlu1 %v492_v20, %s917_s12  ;;  %s328_s12 = scalar_lea.vmem %s1154_s6, %s812_s9 }
  0x4c   : > { %862 = vset.pattern.permute.xlu2 %v920_v24 }
  0x4d   : > { %535 = vperm.xlu2 %862, %v979_v0  }
  0x4f   : > { %v547_v25 = vld.sshfl [vmem:[#allocation1] sm:$0xff pattern:$0x75316420]  ;;  %v548_v26 = vld.sshfl [vmem:[#allocation1 + $0x8] sm:$0xff pattern:$0x75316420] }
  0x50   : > { %551 = vrot.lane.b32.xlu0 %v547_v25, %s921_s14 }
  0x51   : > { %525 = vrot.lane.b32.xlu1 %v520_v23, %s919_s13  ;;  %v474_v23 = vperm.slane %v1048_v54, 5 }
  0x55   : > { %865 = vset.pattern.permute.xlu2 %v905_v1 }
  0x58   : > { %563 = vperm.xlu0 %863, %v979_v0   ;;  %v447_v0 = vperm.slane %v1028_v44, 3 }
  0x59   : > { %553 = vrot.lane.b32.xlu1 %v548_v26, %s921_s14 }
  0x60   : > { %866 = vset.pattern.permute.xlu0 %v905_v1 }
  0x61   : > { %577 = vperm.xlu1 %864, %v574_v27  }
  0x68   : > { %v1013_v28 = vpop.permute.xlu2 %366 }
  0x71   : > { %v339_v29 = vpop.permute.xlu2 %338 }
  0x72   : > { %v343_v14 = vperm.slane %v339_v29, %v342_v60 }
  0x7a   : > { %v1015_v31 = vpop.permute.xlu2 %395 }
  0x83   : > { %v1017_v36 = vpop.permute.xlu2 %423 }
  0x8a   : > { %v353_v30 = vpop.permute.xlu0 %352 }
  0x8c   : > { %v1019_v39 = vpop.permute.xlu2 %451 }
  0x92   : > { %v355_v32 = vpop.permute.xlu0 %354 }
  0x93   : > { %v384_v33 = vpop.permute.xlu1 %383  ;;  %v359_v47 = vsel %vm358_vm0, %v353_v30, %v355_v32  ;;  %v360_v62 = vsel %vm358_vm0, %v355_v32, %v353_v30 }
  0x94   : > { %v364_v55 = vmul.f32 %v362_v46, %v359_v47  ;;  %v363_v10 = vmul.f32 %v361_v59, %v360_v62 }
  0x95   : > { %v1031_v45 = vpop.permute.xlu2 %479 }
  0x96   : > { %v370_v1 = vmul.f32 %v1013_v28, %v364_v55  ;;  %v369_v25 = vmul.f32 %v1013_v28, %v363_v10 }
  0x98   : > { %v373_v18 = vrot.slane %v370_v1, 4 }
  0x9a   : > { %v412_v35 = vpop.permute.xlu0 %411 }
  0x9b   : > { %v386_v34 = vpop.permute.xlu1 %385 }
  0x9c   : > { %v388_v53 = vsel %vm387_vm1, %v384_v33, %v386_v34  ;;  %v389_v63 = vsel %vm387_vm1, %v386_v34, %v384_v33  ;;  %v531_v33 = vperm.slane %v1028_v44, 7  ;;  %v345_v34 = vmul.f32 %v343_v14, %v990_v2 }
  0x9d   : > { %v393_v57 = vmul.f32 %v391_v48, %v388_v53  ;;  %v392_v11 = vmul.f32 %v390_v61, %v389_v63  ;;  %v530_v48 = vperm.slane %v1048_v54, 7 }
  0x9e   : > { %v1066_v5 = vpop.permute.xlu2 %507 }
  0x9f   : > { %v399_v6 = vmul.f32 %v1015_v31, %v393_v57  ;;  %v398_v26 = vmul.f32 %v1015_v31, %v392_v11 }
  0xa1   : > { %v402_v21 = vrot.slane %v399_v6, 4 }
  0xa2   : > { %v440_v38 = vpop.permute.xlu0 %439 }
  0xa3   : > { %v414_v37 = vpop.permute.xlu1 %413  ;;  %v403_v31 = vsel %vm374_vm6, %v398_v26, %v402_v21 }
  0xa4   : > { %v416_v58 = vsel %vm415_vm2, %v412_v35, %v414_v37  ;;  %v417_v15 = vsel %vm415_vm2, %v414_v37, %v412_v35  ;;  %v375_v35 = vsel %vm374_vm6, %v369_v25, %v373_v18 }
  0xa5   : > { %v421_v3 = vmul.f32 %v419_v56, %v416_v58  ;;  %v420_v27 = vmul.f32 %v418_v12, %v417_v15  ;;  %v377_v57 = vadd.f32 %v375_v35, %v345_v34 }
  0xa7   : > { %v427_v19 = vmul.f32 %v1017_v36, %v421_v3  ;;  %v426_v44 = vmul.f32 %v1017_v36, %v420_v27  ;;  %v405_v62 = vadd.f32 %v403_v31, %v377_v57 }
  0xa9   : > { %v430_v37 = vrot.slane %v427_v19, 4 }
  0xaa   : > { %v1021_v42 = vpop.permute.xlu0 %467 }
  0xab   : > { %v442_v41 = vpop.permute.xlu1 %441  ;;  %v431_v58 = vsel %vm374_vm6, %v426_v44, %v430_v37 }
  0xac   : > { %v444_v4 = vsel %vm443_vm3, %v440_v38, %v442_v41  ;;  %v445_v29 = vsel %vm443_vm3, %v442_v41, %v440_v38  ;;  %v502_v41 = vperm.slane %v1048_v54, 6  ;;  %v433_v6 = vadd.f32 %v431_v58, %v405_v62 }
  0xad   : > { %v449_v16 = vmul.f32 %v447_v0, %v444_v4  ;;  %v448_v40 = vmul.f32 %v446_v22, %v445_v29  ;;  %v867_v4 = vld [vmem:[%s1149_s1 + $0x10] ss:$0 sm:$0xff] }
  0xaf   : > { %v455_v30 = vmul.f32 %v1019_v39, %v449_v16  ;;  %v454_v59 = vmul.f32 %v1019_v39, %v448_v40  ;;  %v868_v39 = vld [vmem:[%s1149_s1 + $0x18] ss:$0 sm:$0xff] }
  0xb1   : > { %v458_v51 = vrot.slane %v455_v30, 4 }
  0xb2   : > { %v1038_v50 = vpop.permute.xlu0 %495 }
  0xb3   : > { %v470_v49 = vpop.permute.xlu1 %469  ;;  %v459_v63 = vsel %vm374_vm6, %v454_v59, %v458_v51 }
  0xb4   : > { %v473_v13 = vsel %vm471_vm4, %v470_v49, %v1021_v42  ;;  %v472_v28 = vsel %vm471_vm4, %v1021_v42, %v470_v49  ;;  %v536_v49 = vpop.permute.xlu2 %535  ;;  %v461_v10 = vadd.f32 %v459_v63, %v433_v6 }
  0xb5   : > { %v477_v24 = vmul.f32 %v475_v7, %v473_v13  ;;  %v476_v53 = vmul.f32 %v474_v23, %v472_v28 }
  0xb7   : > { %v483_v38 = vmul.f32 %v1031_v45, %v477_v24  ;;  %v482_v0 = vmul.f32 %v1031_v45, %v476_v53 }
  0xba   : > { %v524_v9 = vpop.permute.xlu0 %523 }
  0xbb   : > { %v498_v8 = vpop.permute.xlu1 %497 }
  0xbc   : > { %v501_v20 = vsel %vm499_vm5, %v498_v8, %v1038_v50  ;;  %v500_v2 = vsel %vm499_vm5, %v1038_v50, %v498_v8  ;;  %v486_v50 = vrot.slane %v483_v38, 4 }
  0xbd   : > { %v505_v32 = vmul.f32 %v503_v17, %v501_v20  ;;  %v504_v61 = vmul.f32 %v502_v41, %v500_v2 }
  0xbe   : > { %v487_v7 = vsel %vm374_vm6, %v482_v0, %v486_v50 }
  0xbf   : > { %v511_v55 = vmul.f32 %v1066_v5, %v505_v32  ;;  %v510_v8 = vmul.f32 %v1066_v5, %v504_v61  ;;  %v489_v17 = vadd.f32 %v487_v7, %v461_v10  ;;  %v655_v32 = vld [vmem:[%s1153_s5] sm:$0xff] }
  0xc0   : > { %658 = vperm.xlu2 %865, %v655_v32  }
  0xc1   : > { %v514_v1 = vrot.slane %v511_v55, 4 }
  0xc2   : > { %v552_v47 = vpop.permute.xlu0 %551 }
  0xc3   : > { %v526_v46 = vpop.permute.xlu1 %525  ;;  %v515_v13 = vsel %vm374_vm6, %v510_v8, %v514_v1 }
  0xc4   : > { %v529_v42 = vsel %vm527_vm7, %v526_v46, %v524_v9  ;;  %v528_v36 = vsel %vm527_vm7, %v524_v9, %v526_v46  ;;  %v517_v20 = vadd.f32 %v515_v13, %v489_v17  ;;  %v600_v46 = vpack.c.bf16 %v599_v52, %v599_v52 }
  0xc5   : > { %v533_v56 = vmul.f32 %v531_v33, %v529_v42  ;;  %v532_v3 = vmul.f32 %v530_v48, %v528_v36 }
  0xc7   : > { %v539_v54 = vmul.f32 %v536_v49, %v533_v56  ;;  %v538_v14 = vmul.f32 %v536_v49, %v532_v3 }
  0xc9   : > { %v542_v43 = vrot.slane %v539_v54, 4 }
  0xca   : > { %v564_v12 = vpop.permute.xlu0 %563 }
  0xcb   : > { %v554_v9 = vpop.permute.xlu1 %553  ;;  %v543_v18 = vsel %vm374_vm6, %v538_v14, %v542_v43 }
  0xcc   : > { %v556_v11 = vsel %vm555_vm8, %v552_v47, %v554_v9  ;;  %v557_v45 = vsel %vm555_vm8, %v554_v9, %v552_v47  ;;  %v545_v23 = vadd.f32 %v543_v18, %v517_v20 }
  0xcd   : > { %v560_v15 = vmul.f32 %v867_v4, %v556_v11  ;;  %v561_v16 = vmul.f32 %v868_v39, %v557_v45 }
  0xcf   : > { %v567_v19 = vmul.f32 %v564_v12, %v561_v16  ;;  %v566_v21 = vmul.f32 %v564_v12, %v560_v15 }
  0xd1   : > { %v570_v22 = vrot.slane %v567_v19, 4 }
  0xd3   : > { %v571_v5 = vsel %vm374_vm6, %v566_v21, %v570_v22  ;;  %v578_v24 = vpop.permute.xlu1 %577 }
  0xd4   : > { %v573_v25 = vadd.f32 %v571_v5, %v545_v23  ;;  %v582_v26 = vperm.slane %v578_v24, %v342_v60 }
  0xd6   : > { %v584_v27 = vadd.f32 %v582_v26, %v573_v25 }
  0xd8   : > { %v585_v29 = vsub.f32 0.0, %v584_v27 }
  0xda   : > { %v586_v30 = vmul.f32 1.442695, %v585_v29 }
  0xdc   : > { %869 = vpow2.f32 %v586_v30 }
  0xe2   : > { %v870_v33 = vpop.eup %869 }
  0xe3   : > { %v588_v34 = vadd.f32 1.0, %v870_v33 }
  0xe5   : > { %871 = vrcp.f32 %v588_v34 }
  0xeb   : > { %v872_v35 = vpop.eup %871 }
  0xec   : > { %v590_v37 = vmul.f32 %v872_v35, %v584_v27 }
  0xee   : > { %602 = vst [vmem:[#allocation1] ss:$2 sm:$0xff] %v590_v37 }
  0xf5   : > { %v603_v60 = vld.sshfl [vmem:[#allocation1] sm:$0xff pattern:$0x75316420]  ;;  %v604_v28 = vld.sshfl [vmem:[#allocation1 + $0x8] sm:$0xff pattern:$0x75316420] }
  0xf6   : > { %v607_v31 = vpack.c.bf16 %v603_v60, %v603_v60  ;;  %v608_v40 = vpack.c.bf16 %v604_v28, %v604_v28 }
  0xf8   : > { %v615_v38 = vsel %vm613_vm9, %v607_v31, 0  ;;  %v618_v41 = vsel %vm613_vm9, %v608_v40, 0 }
  0xf9   : > { %627 = vmatpush.bf16.msra.mxu0 %v615_v38  ;;  %640 = vmatpush.bf16.msra.mxu1 %v618_v41 }
  0xfc   : > { %807 = vmatmul.msk.bf16.vlgmr.msra.gmra.mxu0 %vm609_vm10, %v600_v46  ;;  %808 = vmatmul.msk.bf16.vlgmr.msra.gmra.mxu1 %vm609_vm10, %v600_v46 }
 0x11a   : > { %v659_v47 = vpop.permute.xlu2 %658 }
 0x179   : > { %v629_v44 = vpop.f32.mrf.mxu0  ;;  %v642_v2 = vpop.f32.mrf.mxu1 }
 0x17a   : > { %v661_v48 = vadd.f32 %v659_v47, %v629_v44  ;;  %v662_v42 = vadd.f32 %v659_v47, %v642_v2 }
 0x17c   : > { %v663_v49 = vsub.f32 0.0, %v661_v48  ;;  %v664_v51 = vsub.f32 0.0, %v662_v42 }
 0x17e   : > { %v665_v53 = vmul.f32 1.442695, %v663_v49  ;;  %v667_v55 = vmul.f32 1.442695, %v664_v51 }
 0x180   : > { %873 = vpow2.f32 %v665_v53 }
 0x181   : > { %875 = vpow2.f32 %v667_v55  ;;  %v631_v56 = vpop.f32.mrf.mxu0  ;;  %v644_v57 = vpop.f32.mrf.mxu1 }
 0x186   : > { %v874_v58 = vpop.eup %873 }
 0x187   : > { %v876_v36 = vpop.eup %875  ;;  %v669_v59 = vadd.f32 1.0, %v874_v58 }
 0x188   : > { %v670_v50 = vadd.f32 1.0, %v876_v36 }
 0x189   : > { %877 = vrcp.f32 %v669_v59 }
 0x18a   : > { %879 = vrcp.f32 %v670_v50 }
 0x18f   : > { %v878_v61 = vpop.eup %877 }
 0x190   : > { %v880_v54 = vpop.eup %879  ;;  %v673_v62 = vmul.f32 %v878_v61, %v661_v48 }
 0x191   : > { %v674_v63 = vmul.f32 %v880_v54, %v662_v42 }
 0x192   : > { %675 = vst [vmem:[%s328_s12] sm:$0xff] %v673_v62 }
 0x193   : > { %676 = vst [vmem:[%s328_s12 + $0x8] sm:$0xff] %v674_v63 }
 0x194 PF: > { %s16_s23 = sadd.s32 1, %s903_s23   ;;  %s1155_s21 = smov %s899_s22 }
 0x195   : > { %p13_p5 = scmp.ge.s32.totalorder %s16_s23, 4   ;;  %s1156_s22 = smov %s1158_s24 }
 0x197   :  { %15 = sbr.rel (!%p13_p5) target bundleno = 2 (0x2), region = 91 }

</bundles_post_ra>
